<compile_context>
chip_gen: v5e
topology: v5e:2x2
jax: 0.10.0
libtpu: 0.0.40
codegen_flags: <defaults>
</compile_context>

<pallas_src>
import math

import jax
import jax.numpy as jnp
import numpy as np
from jax.experimental import pallas as pl
from jax.experimental.pallas import tpu as pltpu

# ----------------------------- config (small synthetic sizes) ----------------
BATCH = 2
VIS_SEQ = 9            # 1 CLS token + 8 patch tokens from the vision encoder
N_PATCH = VIS_SEQ - 1  # patch tokens actually attended over (CLS dropped)
TXT_SEQ = 8            # padded text sequence length from the text encoder
VIS_DIM = 48           # vision_encoder.config.hidden_size (small stand-in)
TXT_DIM = 32           # text_encoder.config.hidden_size   (small stand-in)
NUM_HEADS = 8          # nn.MultiheadAttention(txt_dim, 8)
HEAD_DIM = TXT_DIM // NUM_HEADS
CLS_HIDDEN = 512       # classifier: Linear(txt_dim, 512) -> ReLU -> Linear(512, C)
NUM_CLASSES = 6
OUT_PAD = 128          # lane-dense padded logits width (sliced to 6 in wrapper)

GROUP = max(8, 1 << (N_PATCH - 1).bit_length())   # key lanes reserved per head
SCORE_W = NUM_HEADS * GROUP                        # lane-dense score width

assert TXT_DIM % NUM_HEADS == 0
assert GROUP >= N_PATCH

_HIGH = jax.lax.Precision.HIGHEST   # reference only


def _r8(n):
    return ((n + 7) // 8) * 8


# -------- packed bf16 weight slab (128 lanes wide), sublane-aligned rows ------
R_WQ = 0                                # (TXT_DIM, TXT_DIM)  q proj, 1/sqrt(hd) folded in
R_WKVT = R_WQ + _r8(TXT_DIM)            # (2*TXT_DIM, TXT_DIM) [wk.T ; wv.T] fused
R_WO = R_WKVT + _r8(2 * TXT_DIM)        # (TXT_DIM, TXT_DIM)  attn out_proj
R_WP = R_WO + _r8(TXT_DIM)              # (VIS_DIM, TXT_DIM)  img_proj
R_TSEL = R_WP + _r8(VIS_DIM)            # (VIS_SEQ, SCORE_W)  CLS-drop + per-head tiling
R_GSUM = R_TSEL + _r8(VIS_SEQ)          # (SCORE_W, NUM_HEADS) per-head lane-group sum
R_REXP = R_GSUM + _r8(SCORE_W)          # (NUM_HEADS, SCORE_W) broadcast back, /TXT_SEQ folded
R_MASK = R_REXP + _r8(NUM_HEADS)        # (2*TXT_DIM, SCORE_W) block-diag head mask for K|V
R_W2 = R_MASK + _r8(2 * TXT_DIM)        # (CLS_HIDDEN, OUT_PAD) classifier layer 2, padded
WS_ROWS = R_W2 + _r8(CLS_HIDDEN)

# -------- packed f32 row-bias slab (1, BR_W) ----------------------------------
O_B1 = 0                                # (CLS_HIDDEN,)
O_B2 = O_B1 + CLS_HIDDEN                # (OUT_PAD,)   padded classifier bias
O_NEG = O_B2 + OUT_PAD                  # (SCORE_W,)   -inf for padded key lanes
O_BQ = O_NEG + 128                      # (TXT_DIM,)   q bias, 1/sqrt(hd) folded in
O_BP = O_BQ + TXT_DIM                   # (TXT_DIM,)   img_proj bias
O_BO = O_BP + TXT_DIM                   # (TXT_DIM,)   out_proj bias
BR_W = O_BO + TXT_DIM


def _b16(x):
    return x.astype(jnp.bfloat16)


def _mm(a, b):
    # MXU-native bf16 x bf16 matmul, f32 accumulation.
    return jnp.dot(a, b, preferred_element_type=jnp.float32)


def _mm_nt(a, b):
    # a @ b.T (contract last dims of both), f32 accumulation.
    return jax.lax.dot_general(a, b, (((1,), (1,)), ((), ())),
                               preferred_element_type=jnp.float32)


# ----------------------------- Pallas kernel ---------------------------------
def _head_kernel(v_ref, t_ref, ws_ref, w1_ref, br_ref, bkv_ref, out_ref):
    """img_proj -> cross-attn(q=text, k=v=image) -> mean-pool -> MLP, whole batch."""
    E, H, St, SW = TXT_DIM, NUM_HEADS, TXT_SEQ, SCORE_W

    # ---- static slices of the packed slabs (one DMA each for ws/w1/br/bkv) ----
    wq = ws_ref[R_WQ:R_WQ + E, :E]                    # (E, E)      bf16, scale folded
    wkvT = ws_ref[R_WKVT:R_WKVT + 2 * E, :E]          # (2E, E)     fused [wk.T; wv.T]
    wo = ws_ref[R_WO:R_WO + E, :E]                    # (E, E)
    wp = ws_ref[R_WP:R_WP + VIS_DIM, :E]              # (Vd, E)
    tsel = ws_ref[R_TSEL:R_TSEL + VIS_SEQ, :SW]       # (Sv+1, SW)  0/1: drop CLS + tile
    gsum = ws_ref[R_GSUM:R_GSUM + SW, :H]             # (SW, H)     0/1: per-head sum
    rexp = ws_ref[R_REXP:R_REXP + H, :SW]             # (H, SW)     broadcast, 1/St folded
    m2 = ws_ref[R_MASK:R_MASK + 2 * E, :SW]           # (2E, SW)    0/1 block-diag head mask
    w2 = ws_ref[R_W2:R_W2 + CLS_HIDDEN, :OUT_PAD]     # (512, 128)
    w1 = w1_ref[...]                                  # (E, 512)

    bq = br_ref[:, O_BQ:O_BQ + E]
    bp = br_ref[:, O_BP:O_BP + E]
    bo = br_ref[:, O_BO:O_BO + E]
    b1 = br_ref[:, O_B1:O_B1 + CLS_HIDDEN]
    b2 = br_ref[:, O_B2:O_B2 + OUT_PAD]
    neg = br_ref[:, O_NEG:O_NEG + SW]                 # additive -inf pad mask (zeros here)
    bkv = bkv_ref[...]                                # (2E, 1) column bias for K|V rows

    # ---- query projection, both batch elements stacked (one matmul) ----------
    q_all = _b16(_mm(_b16(t_ref[...]), wq) + bq)      # (B*St, E)

    pooled_rows = []
    for b in range(BATCH):                            # static, unrolled (B = 2)
        # image tokens -> img_proj (CLS row kept; dropped by tsel below)
        v_b = _b16(v_ref[b, :, :])                    # (Sv+1, Vd)
        vproj = _mm(v_b, wp) + bp                     # (Sv+1, E)  f32

        # fused K|V projection in transposed orientation (no explicit transpose:
        # contraction over the last dims), then one matmul with the constant
        # tsel simultaneously drops the CLS row and tiles the patch axis into
        # per-head lane groups; the 0/1 mask applies the block-diagonal head
        # structure; bias added in f32; cast to bf16 ONCE before slicing.
        kvT = _mm_nt(wkvT, _b16(vproj))               # (2E, Sv+1)
        kv_bd = _b16((_mm(_b16(kvT), tsel) + bkv) * m2)   # (2E, SW)
        kbd = kv_bd[:E, :]                            # (E, SW)  block-diagonal K^T
        vbdT = kv_bd[E:, :]                           # (E, SW)  block-diagonal V^T

        # all head scores in ONE lane-dense matmul -> (St, H*GROUP)
        q_b = q_all[b * St:(b + 1) * St, :]
        s = _mm(q_b, kbd) + neg                       # (St, SW)  f32
        mx = jnp.max(s, axis=-1, keepdims=True)       # row max (exact softmax, stable)
        ex = jnp.exp(s - mx)                          # (St, SW)  one exp over all heads
        r = _mm(_b16(ex), gsum)                       # (St, H)   per-head denominators
        inv = _b16(pl.reciprocal(r, approx=True))     # EUP
        wful = _mm(inv, rexp)                         # (St, SW)  1/(St*denom) per lane group
        pbar = jnp.sum(wful * ex, axis=0, keepdims=True)   # (1, SW) mean-pooled probs

        # pooled attention output with heads already concatenated: (1, E)
        pooled_rows.append(_mm_nt(_b16(pbar), vbdT))

    pooled = _b16(jnp.concatenate(pooled_rows, axis=0))    # (B, E)

    # out_proj (mean-pool hoisted in front of it) + classifier MLP, stacked over B
    attn = _mm(pooled, wo) + bo                       # (B, E)
    h1 = jnp.maximum(_mm(_b16(attn), w1) + b1, 0.0)   # (B, 512) ReLU
    # Dropout(0.2) is inference-mode identity.
    out_ref[...] = _mm(_b16(h1), w2) + b2             # (B, OUT_PAD) lane-dense logits


# ----------------------------- one-time parameter packing ---------------------
def pack_params(p):
    """Hoisted per-call prep: fuse KV, fold scales, build constant 0/1 matrices,
    pad the classifier, pack everything into a bf16 weight slab + f32 bias slabs."""
    E, V, Hd, C = TXT_DIM, VIS_DIM, CLS_HIDDEN, NUM_CLASSES
    H, hd, G, SW = NUM_HEADS, HEAD_DIM, GROUP, SCORE_W
    scale = 1.0 / math.sqrt(hd)

    ws = np.zeros((WS_ROWS, 128), np.float32)
    ws[R_WQ:R_WQ + E, :E] = np.asarray(p["wq"]) * scale
    ws[R_WKVT:R_WKVT + 2 * E, :E] = np.concatenate(
        [np.asarray(p["wk"]).T, np.asarray(p["wv"]).T], axis=0)
    ws[R_WO:R_WO + E, :E] = np.asarray(p["wo"])
    ws[R_WP:R_WP + V, :E] = np.asarray(p["wp"])

    lane = np.arange(SW)
    j = lane % G
    valid = j < N_PATCH
    # tsel: drops the CLS row (row 0) and tiles patch j into every head's lane group.
    tsel = np.zeros((VIS_SEQ, SW), np.float32)
    tsel[(j + 1)[valid], lane[valid]] = 1.0
    ws[R_TSEL:R_TSEL + VIS_SEQ, :SW] = tsel
    # gsum: per-head lane-group summation matrix.
    gsum = (lane[:, None] // G == np.arange(H)[None, :]).astype(np.float32)
    ws[R_GSUM:R_GSUM + SW, :H] = gsum
    # rexp: broadcast per-head scalars back onto lane groups, mean-pool 1/St folded in.
    ws[R_REXP:R_REXP + H, :SW] = gsum.T / TXT_SEQ
    # m2: block-diagonal head mask for the fused K (rows 0:E) / V (rows E:2E) slab.
    row_head = (np.arange(2 * E) % E) // hd
    ws[R_MASK:R_MASK + 2 * E, :SW] = (row_head[:, None] == lane[None, :] // G
                                      ).astype(np.float32)
    # classifier layer 2, lane-padded to OUT_PAD.
    ws[R_W2:R_W2 + Hd, :C] = np.asarray(p["w2"])

    br = np.zeros((1, BR_W), np.float32)
    br[0, O_B1:O_B1 + Hd] = np.asarray(p["b1"])
    br[0, O_B2:O_B2 + C] = np.asarray(p["b2"])
    br[0, O_NEG:O_NEG + SW] = np.where(valid, 0.0, -1e30)
    br[0, O_BQ:O_BQ + E] = np.asarray(p["bq"]) * scale
    br[0, O_BP:O_BP + E] = np.asarray(p["bp"])
    br[0, O_BO:O_BO + E] = np.asarray(p["bo"])

    bkv = np.concatenate([np.asarray(p["bk"]), np.asarray(p["bv"])]).reshape(2 * E, 1)

    return {
        "ws": jnp.asarray(ws, jnp.bfloat16),
        "w1": jnp.asarray(np.asarray(p["w1"]), jnp.bfloat16),
        "br": jnp.asarray(br, jnp.float32),
        "bkv": jnp.asarray(bkv, jnp.float32),
    }


# ----------------------------- wrapper / glue ---------------------------------
def clip_head_forward(v_hidden, t_hidden, packed):
    """v_hidden: (B, 1+patches, vis_dim) vision last_hidden_state;
       t_hidden: (B, txt_seq, txt_dim)  text last_hidden_state;
       packed:   output of pack_params (built once)."""
    B = v_hidden.shape[0]
    assert B == BATCH and v_hidden.shape[1:] == (VIS_SEQ, VIS_DIM)
    assert t_hidden.shape == (BATCH, TXT_SEQ, TXT_DIM)

    t2 = t_hidden.reshape(B * TXT_SEQ, TXT_DIM)       # free reshape; stacked queries
    args = (v_hidden, t2, packed["ws"], packed["w1"], packed["br"], packed["bkv"])

    def _full(a):   # whole (tiny) array resident in VMEM, single block
        return pl.BlockSpec(a.shape, lambda i, _nd=a.ndim: (0,) * _nd)

    out = pl.pallas_call(
        _head_kernel,
        grid=(1,),                                    # single invocation: batch folded
        out_shape=jax.ShapeDtypeStruct((B, OUT_PAD), jnp.float32),
        in_specs=[_full(a) for a in args],
        out_specs=pl.BlockSpec((B, OUT_PAD), lambda i: (0, 0)),
        compiler_params=pltpu.CompilerParams(
            dimension_semantics=("arbitrary",)),      # no megacore split at this size
        cost_estimate=pl.CostEstimate(
            flops=800_000, transcendentals=1_500, bytes_accessed=320_000),
    )(*args)
    return out[:, :NUM_CLASSES]


# ----------------------------- deterministic params ---------------------------
def init_params(key):
    def lin(k, fan_in, shape):
        bound = 1.0 / math.sqrt(fan_in)
        return jax.random.uniform(k, shape, jnp.float32, -bound, bound)

    ks = jax.random.split(key, 14)
    E, V, Hd, C = TXT_DIM, VIS_DIM, CLS_HIDDEN, NUM_CLASSES
    return {
        # img_proj: nn.Linear(vis_dim, txt_dim)        (stored as (in, out))
        "wp": lin(ks[0], V, (V, E)), "bp": lin(ks[1], V, (E,)),
        # cross_attn in_proj (q / k / v pieces of in_proj_weight)
        "wq": lin(ks[2], E, (E, E)), "bq": lin(ks[3], E, (E,)),
        "wk": lin(ks[4], E, (E, E)), "bk": lin(ks[5], E, (E,)),
        "wv": lin(ks[6], E, (E, E)), "bv": lin(ks[7], E, (E,)),
        # cross_attn out_proj
        "wo": lin(ks[8], E, (E, E)), "bo": lin(ks[9], E, (E,)),
        # classifier MLP
        "w1": lin(ks[10], E, (E, Hd)), "b1": lin(ks[11], E, (Hd,)),
        "w2": lin(ks[12], Hd, (Hd, C)), "b2": lin(ks[13], Hd, (C,)),
    }


# ----------------------------- pure-JAX reference (f32, HIGHEST) --------------
def reference_forward(v_hidden, t_hidden, p):
    B, St, E = t_hidden.shape
    H, hd = NUM_HEADS, HEAD_DIM
    v = v_hidden[:, 1:, :]
    Sv = v.shape[1]
    vproj = jnp.einsum("bsd,de->bse", v, p["wp"], precision=_HIGH) + p["bp"]
    q = jnp.einsum("bse,ef->bsf", t_hidden, p["wq"], precision=_HIGH) + p["bq"]
    k = jnp.einsum("bse,ef->bsf", vproj, p["wk"], precision=_HIGH) + p["bk"]
    vv = jnp.einsum("bse,ef->bsf", vproj, p["wv"], precision=_HIGH) + p["bv"]
    qh = q.reshape(B, St, H, hd).transpose(0, 2, 1, 3)
    kh = k.reshape(B, Sv, H, hd).transpose(0, 2, 1, 3)
    vh = vv.reshape(B, Sv, H, hd).transpose(0, 2, 1, 3)
    s = jnp.einsum("bhqd,bhkd->bhqk", qh, kh, precision=_HIGH) / math.sqrt(hd)
    a = jax.nn.softmax(s, axis=-1)
    o = jnp.einsum("bhqk,bhkd->bhqd", a, vh, precision=_HIGH)
    o = o.transpose(0, 2, 1, 3).reshape(B, St, E)
    attn = jnp.einsum("bse,ef->bsf", o, p["wo"], precision=_HIGH) + p["bo"]
    pooled = attn.mean(axis=1)
    h1 = jax.nn.relu(jnp.dot(pooled, p["w1"], precision=_HIGH) + p["b1"])
    return jnp.dot(h1, p["w2"], precision=_HIGH) + p["b2"]


# ----------------------------- main -------------------------------------------
if __name__ == "__main__":
    key = jax.random.PRNGKey(0)
    k_img, k_txt, k_par = jax.random.split(key, 3)

    # Deterministic stand-ins for the encoder outputs.
    v_hidden = jax.random.normal(k_img, (BATCH, VIS_SEQ, VIS_DIM), jnp.float32)
    t_hidden = jax.random.normal(k_txt, (BATCH, TXT_SEQ, TXT_DIM), jnp.float32)
    params = init_params(k_par)
    packed = pack_params(params)          # one-time prep (hoisted out of forward)

    out = clip_head_forward(v_hidden, t_hidden, packed)
    out = jax.block_until_ready(out)

    ref = reference_forward(v_hidden, t_hidden, params)
    assert out.shape == (BATCH, NUM_CLASSES)
    # Kernel uses bf16 MXU-native matmuls (f32 accumulation) + approx reciprocal,
    # so compare against the f32/HIGHEST reference with a bf16-level tolerance.
    if not np.allclose(np.asarray(out), np.asarray(ref), rtol=2e-2, atol=2e-2):
        raise AssertionError("Pallas kernel does not match JAX reference")
    print("KERNEL_OK")
</pallas_src>

<mosaic_0001>
module attributes {stable_mosaic.version = 11 : i64} {
  func.func @_head_kernel(%arg0: i32, %arg1: memref<2x9x48xf32, #tpu.memory_space<vmem>>, %arg2: memref<16x32xf32, #tpu.memory_space<vmem>>, %arg3: memref<840x128xbf16, #tpu.memory_space<vmem>>, %arg4: memref<32x512xbf16, #tpu.memory_space<vmem>>, %arg5: memref<1x864xf32, #tpu.memory_space<vmem>>, %arg6: memref<64x1xf32, #tpu.memory_space<vmem>>, %arg7: memref<2x128xf32, #tpu.memory_space<vmem>>) attributes {dimension_semantics = [#tpu.dimension_semantics<arbitrary>], iteration_bounds = array<i64: 1>, scalar_prefetch = 0 : i64, scratch_operands = 0 : i64, tpu.core_type = #tpu.core_type<tc>, window_params = [{pipeline_mode = #tpu.pipeline_mode<synchronous>, transform_indices = @transform_0, window_bounds = array<i64: 2, 9, 48>}, {pipeline_mode = #tpu.pipeline_mode<synchronous>, transform_indices = @transform_1, window_bounds = array<i64: 16, 32>}, {pipeline_mode = #tpu.pipeline_mode<synchronous>, transform_indices = @transform_2, window_bounds = array<i64: 840, 128>}, {pipeline_mode = #tpu.pipeline_mode<synchronous>, transform_indices = @transform_3, window_bounds = array<i64: 32, 512>}, {pipeline_mode = #tpu.pipeline_mode<synchronous>, transform_indices = @transform_4, window_bounds = array<i64: 1, 864>}, {pipeline_mode = #tpu.pipeline_mode<synchronous>, transform_indices = @transform_5, window_bounds = array<i64: 64, 1>}, {pipeline_mode = #tpu.pipeline_mode<synchronous>, transform_indices = @transform_6, window_bounds = array<i64: 2, 128>}]} {
    %c0 = arith.constant 0 : index
    %c0_0 = arith.constant 0 : index
    %0 = vector.load %arg3[%c0, %c0_0] : memref<840x128xbf16, #tpu.memory_space<vmem>>, vector<32x32xbf16>
    %c32 = arith.constant 32 : index
    %c0_1 = arith.constant 0 : index
    %1 = vector.load %arg3[%c32, %c0_1] : memref<840x128xbf16, #tpu.memory_space<vmem>>, vector<64x32xbf16>
    %c96 = arith.constant 96 : index
    %c0_2 = arith.constant 0 : index
    %2 = vector.load %arg3[%c96, %c0_2] : memref<840x128xbf16, #tpu.memory_space<vmem>>, vector<32x32xbf16>
    %c128 = arith.constant 128 : index
    %c0_3 = arith.constant 0 : index
    %3 = vector.load %arg3[%c128, %c0_3] : memref<840x128xbf16, #tpu.memory_space<vmem>>, vector<48x32xbf16>
    %c176 = arith.constant 176 : index
    %c0_4 = arith.constant 0 : index
    %4 = vector.load %arg3[%c176, %c0_4] : memref<840x128xbf16, #tpu.memory_space<vmem>>, vector<9x64xbf16>
    %c192 = arith.constant 192 : index
    %c0_5 = arith.constant 0 : index
    %5 = vector.load %arg3[%c192, %c0_5] : memref<840x128xbf16, #tpu.memory_space<vmem>>, vector<64x8xbf16>
    %c256 = arith.constant 256 : index
    %c0_6 = arith.constant 0 : index
    %6 = vector.load %arg3[%c256, %c0_6] : memref<840x128xbf16, #tpu.memory_space<vmem>>, vector<8x64xbf16>
    %c264 = arith.constant 264 : index
    %c0_7 = arith.constant 0 : index
    %7 = vector.load %arg3[%c264, %c0_7] : memref<840x128xbf16, #tpu.memory_space<vmem>>, vector<64x64xbf16>
    %c328 = arith.constant 328 : index
    %c0_8 = arith.constant 0 : index
    %8 = vector.load %arg3[%c328, %c0_8] : memref<840x128xbf16, #tpu.memory_space<vmem>>, vector<512x128xbf16>
    %c0_9 = arith.constant 0 : index
    %c0_10 = arith.constant 0 : index
    %9 = vector.load %arg4[%c0_9, %c0_10] : memref<32x512xbf16, #tpu.memory_space<vmem>>, vector<32x512xbf16>
    %c0_11 = arith.constant 0 : index
    %c768 = arith.constant 768 : index
    %10 = vector.load %arg5[%c0_11, %c768] : memref<1x864xf32, #tpu.memory_space<vmem>>, vector<1x32xf32>
    %c0_12 = arith.constant 0 : index
    %c800 = arith.constant 800 : index
    %11 = vector.load %arg5[%c0_12, %c800] : memref<1x864xf32, #tpu.memory_space<vmem>>, vector<1x32xf32>
    %c0_13 = arith.constant 0 : index
    %c832 = arith.constant 832 : index
    %12 = vector.load %arg5[%c0_13, %c832] : memref<1x864xf32, #tpu.memory_space<vmem>>, vector<1x32xf32>
    %c0_14 = arith.constant 0 : index
    %c0_15 = arith.constant 0 : index
    %13 = vector.load %arg5[%c0_14, %c0_15] : memref<1x864xf32, #tpu.memory_space<vmem>>, vector<1x512xf32>
    %c0_16 = arith.constant 0 : index
    %c512 = arith.constant 512 : index
    %14 = vector.load %arg5[%c0_16, %c512] : memref<1x864xf32, #tpu.memory_space<vmem>>, vector<1x128xf32>
    %c0_17 = arith.constant 0 : index
    %c640 = arith.constant 640 : index
    %15 = vector.load %arg5[%c0_17, %c640] : memref<1x864xf32, #tpu.memory_space<vmem>>, vector<1x64xf32>
    %c0_18 = arith.constant 0 : index
    %c0_19 = arith.constant 0 : index
    %16 = vector.load %arg6[%c0_18, %c0_19] : memref<64x1xf32, #tpu.memory_space<vmem>>, vector<64x1xf32>
    %c0_20 = arith.constant 0 : index
    %c0_21 = arith.constant 0 : index
    %17 = vector.load %arg2[%c0_20, %c0_21] : memref<16x32xf32, #tpu.memory_space<vmem>>, vector<16x32xf32>
    %18 = arith.truncf %17 : vector<16x32xf32> to vector<16x32xbf16>
    %cst = arith.constant dense<0.000000e+00> : vector<16x32xf32>
    %19 = tpu.matmul %18, %0, %cst {dimension_numbers = #tpu.dot_dimension_numbers<[1], [0], [0], [1], [0, 0, 1, 1], [], []>} : vector<16x32xbf16>, vector<32x32xbf16>, vector<16x32xf32> -> vector<16x32xf32>
    %20 = vector.broadcast %10 : vector<1x32xf32> to vector<16x32xf32>
    %21 = arith.addf %19, %20 : vector<16x32xf32>
    %22 = arith.truncf %21 : vector<16x32xf32> to vector<16x32xbf16>
    %c0_22 = arith.constant 0 : index
    %c0_23 = arith.constant 0 : index
    %c0_24 = arith.constant 0 : index
    %23 = vector.load %arg1[%c0_22, %c0_23, %c0_24] : memref<2x9x48xf32, #tpu.memory_space<vmem>>, vector<1x9x48xf32>
    %24 = vector.shape_cast %23 : vector<1x9x48xf32> to vector<9x48xf32>
    %25 = arith.truncf %24 : vector<9x48xf32> to vector<9x48xbf16>
    %cst_25 = arith.constant dense<0.000000e+00> : vector<9x32xf32>
    %26 = tpu.matmul %25, %3, %cst_25 {dimension_numbers = #tpu.dot_dimension_numbers<[1], [0], [0], [1], [0, 0, 1, 1], [], []>} : vector<9x48xbf16>, vector<48x32xbf16>, vector<9x32xf32> -> vector<9x32xf32>
    %27 = vector.broadcast %11 : vector<1x32xf32> to vector<9x32xf32>
    %28 = arith.addf %26, %27 : vector<9x32xf32>
    %29 = arith.truncf %28 : vector<9x32xf32> to vector<9x32xbf16>
    %cst_26 = arith.constant dense<0.000000e+00> : vector<64x9xf32>
    %30 = tpu.matmul %1, %29, %cst_26 {dimension_numbers = #tpu.dot_dimension_numbers<[1], [1], [0], [0], [0, 0, 1, 0], [], []>} : vector<64x32xbf16>, vector<9x32xbf16>, vector<64x9xf32> -> vector<64x9xf32>
    %31 = arith.truncf %30 : vector<64x9xf32> to vector<64x9xbf16>
    %cst_27 = arith.constant dense<0.000000e+00> : vector<64x64xf32>
    %32 = tpu.matmul %31, %4, %cst_27 {dimension_numbers = #tpu.dot_dimension_numbers<[1], [0], [0], [1], [0, 0, 1, 1], [], []>} : vector<64x9xbf16>, vector<9x64xbf16>, vector<64x64xf32> -> vector<64x64xf32>
    %33 = vector.broadcast %16 : vector<64x1xf32> to vector<64x64xf32>
    %34 = arith.addf %32, %33 : vector<64x64xf32>
    %35 = arith.extf %7 : vector<64x64xbf16> to vector<64x64xf32>
    %36 = arith.mulf %34, %35 : vector<64x64xf32>
    %37 = arith.truncf %36 : vector<64x64xf32> to vector<64x64xbf16>
    %38 = vector.extract_strided_slice %37 {offsets = [0, 0], sizes = [32, 64], strides = [1, 1]} : vector<64x64xbf16> to vector<32x64xbf16>
    %39 = vector.extract_strided_slice %37 {offsets = [32, 0], sizes = [32, 64], strides = [1, 1]} : vector<64x64xbf16> to vector<32x64xbf16>
    %40 = vector.extract_strided_slice %22 {offsets = [0, 0], sizes = [8, 32], strides = [1, 1]} : vector<16x32xbf16> to vector<8x32xbf16>
    %cst_28 = arith.constant dense<0.000000e+00> : vector<8x64xf32>
    %41 = tpu.matmul %40, %38, %cst_28 {dimension_numbers = #tpu.dot_dimension_numbers<[1], [0], [0], [1], [0, 0, 1, 1], [], []>} : vector<8x32xbf16>, vector<32x64xbf16>, vector<8x64xf32> -> vector<8x64xf32>
    %42 = vector.broadcast %15 : vector<1x64xf32> to vector<8x64xf32>
    %43 = arith.addf %41, %42 : vector<8x64xf32>
    %cst_29 = arith.constant dense<0xFF800000> : vector<8xf32>
    %44 = vector.multi_reduction <maximumf>, %43, %cst_29 [1] : vector<8x64xf32> to vector<8xf32>
    %45 = vector.shape_cast %44 : vector<8xf32> to vector<8x1xf32>
    %46 = vector.broadcast %45 : vector<8x1xf32> to vector<8x64xf32>
    %47 = arith.subf %43, %46 : vector<8x64xf32>
    %48 = math.exp %47 : vector<8x64xf32>
    %49 = arith.truncf %48 : vector<8x64xf32> to vector<8x64xbf16>
    %cst_30 = arith.constant dense<0.000000e+00> : vector<8x8xf32>
    %50 = tpu.matmul %49, %5, %cst_30 {dimension_numbers = #tpu.dot_dimension_numbers<[1], [0], [0], [1], [0, 0, 1, 1], [], []>} : vector<8x64xbf16>, vector<64x8xbf16>, vector<8x8xf32> -> vector<8x8xf32>
    %51 = tpu.reciprocal %50 {approx = true} : vector<8x8xf32> -> vector<8x8xf32>
    %52 = arith.truncf %51 : vector<8x8xf32> to vector<8x8xbf16>
    %cst_31 = arith.constant dense<0.000000e+00> : vector<8x64xf32>
    %53 = tpu.matmul %52, %6, %cst_31 {dimension_numbers = #tpu.dot_dimension_numbers<[1], [0], [0], [1], [0, 0, 1, 1], [], []>} : vector<8x8xbf16>, vector<8x64xbf16>, vector<8x64xf32> -> vector<8x64xf32>
    %54 = arith.mulf %53, %48 : vector<8x64xf32>
    %cst_32 = arith.constant dense<0.000000e+00> : vector<64xf32>
    %55 = vector.multi_reduction <add>, %54, %cst_32 [0] : vector<8x64xf32> to vector<64xf32>
    %56 = vector.shape_cast %55 : vector<64xf32> to vector<1x64xf32>
    %57 = arith.truncf %56 : vector<1x64xf32> to vector<1x64xbf16>
    %cst_33 = arith.constant dense<0.000000e+00> : vector<1x32xf32>
    %58 = tpu.matmul %57, %39, %cst_33 {dimension_numbers = #tpu.dot_dimension_numbers<[1], [1], [0], [0], [0, 0, 1, 0], [], []>} : vector<1x64xbf16>, vector<32x64xbf16>, vector<1x32xf32> -> vector<1x32xf32>
    %c1 = arith.constant 1 : index
    %c0_34 = arith.constant 0 : index
    %c0_35 = arith.constant 0 : index
    %59 = vector.load %arg1[%c1, %c0_34, %c0_35] : memref<2x9x48xf32, #tpu.memory_space<vmem>>, vector<1x9x48xf32>
    %60 = vector.shape_cast %59 : vector<1x9x48xf32> to vector<9x48xf32>
    %61 = arith.truncf %60 : vector<9x48xf32> to vector<9x48xbf16>
    %cst_36 = arith.constant dense<0.000000e+00> : vector<9x32xf32>
    %62 = tpu.matmul %61, %3, %cst_36 {dimension_numbers = #tpu.dot_dimension_numbers<[1], [0], [0], [1], [0, 0, 1, 1], [], []>} : vector<9x48xbf16>, vector<48x32xbf16>, vector<9x32xf32> -> vector<9x32xf32>
    %63 = vector.broadcast %11 : vector<1x32xf32> to vector<9x32xf32>
    %64 = arith.addf %62, %63 : vector<9x32xf32>
    %65 = arith.truncf %64 : vector<9x32xf32> to vector<9x32xbf16>
    %cst_37 = arith.constant dense<0.000000e+00> : vector<64x9xf32>
    %66 = tpu.matmul %1, %65, %cst_37 {dimension_numbers = #tpu.dot_dimension_numbers<[1], [1], [0], [0], [0, 0, 1, 0], [], []>} : vector<64x32xbf16>, vector<9x32xbf16>, vector<64x9xf32> -> vector<64x9xf32>
    %67 = arith.truncf %66 : vector<64x9xf32> to vector<64x9xbf16>
    %cst_38 = arith.constant dense<0.000000e+00> : vector<64x64xf32>
    %68 = tpu.matmul %67, %4, %cst_38 {dimension_numbers = #tpu.dot_dimension_numbers<[1], [0], [0], [1], [0, 0, 1, 1], [], []>} : vector<64x9xbf16>, vector<9x64xbf16>, vector<64x64xf32> -> vector<64x64xf32>
    %69 = vector.broadcast %16 : vector<64x1xf32> to vector<64x64xf32>
    %70 = arith.addf %68, %69 : vector<64x64xf32>
    %71 = arith.extf %7 : vector<64x64xbf16> to vector<64x64xf32>
    %72 = arith.mulf %70, %71 : vector<64x64xf32>
    %73 = arith.truncf %72 : vector<64x64xf32> to vector<64x64xbf16>
    %74 = vector.extract_strided_slice %73 {offsets = [0, 0], sizes = [32, 64], strides = [1, 1]} : vector<64x64xbf16> to vector<32x64xbf16>
    %75 = vector.extract_strided_slice %73 {offsets = [32, 0], sizes = [32, 64], strides = [1, 1]} : vector<64x64xbf16> to vector<32x64xbf16>
    %76 = vector.extract_strided_slice %22 {offsets = [8, 0], sizes = [8, 32], strides = [1, 1]} : vector<16x32xbf16> to vector<8x32xbf16>
    %cst_39 = arith.constant dense<0.000000e+00> : vector<8x64xf32>
    %77 = tpu.matmul %76, %74, %cst_39 {dimension_numbers = #tpu.dot_dimension_numbers<[1], [0], [0], [1], [0, 0, 1, 1], [], []>} : vector<8x32xbf16>, vector<32x64xbf16>, vector<8x64xf32> -> vector<8x64xf32>
    %78 = vector.broadcast %15 : vector<1x64xf32> to vector<8x64xf32>
    %79 = arith.addf %77, %78 : vector<8x64xf32>
    %cst_40 = arith.constant dense<0xFF800000> : vector<8xf32>
    %80 = vector.multi_reduction <maximumf>, %79, %cst_40 [1] : vector<8x64xf32> to vector<8xf32>
    %81 = vector.shape_cast %80 : vector<8xf32> to vector<8x1xf32>
    %82 = vector.broadcast %81 : vector<8x1xf32> to vector<8x64xf32>
    %83 = arith.subf %79, %82 : vector<8x64xf32>
    %84 = math.exp %83 : vector<8x64xf32>
    %85 = arith.truncf %84 : vector<8x64xf32> to vector<8x64xbf16>
    %cst_41 = arith.constant dense<0.000000e+00> : vector<8x8xf32>
    %86 = tpu.matmul %85, %5, %cst_41 {dimension_numbers = #tpu.dot_dimension_numbers<[1], [0], [0], [1], [0, 0, 1, 1], [], []>} : vector<8x64xbf16>, vector<64x8xbf16>, vector<8x8xf32> -> vector<8x8xf32>
    %87 = tpu.reciprocal %86 {approx = true} : vector<8x8xf32> -> vector<8x8xf32>
    %88 = arith.truncf %87 : vector<8x8xf32> to vector<8x8xbf16>
    %cst_42 = arith.constant dense<0.000000e+00> : vector<8x64xf32>
    %89 = tpu.matmul %88, %6, %cst_42 {dimension_numbers = #tpu.dot_dimension_numbers<[1], [0], [0], [1], [0, 0, 1, 1], [], []>} : vector<8x8xbf16>, vector<8x64xbf16>, vector<8x64xf32> -> vector<8x64xf32>
    %90 = arith.mulf %89, %84 : vector<8x64xf32>
    %cst_43 = arith.constant dense<0.000000e+00> : vector<64xf32>
    %91 = vector.multi_reduction <add>, %90, %cst_43 [0] : vector<8x64xf32> to vector<64xf32>
    %92 = vector.shape_cast %91 : vector<64xf32> to vector<1x64xf32>
    %93 = arith.truncf %92 : vector<1x64xf32> to vector<1x64xbf16>
    %cst_44 = arith.constant dense<0.000000e+00> : vector<1x32xf32>
    %94 = tpu.matmul %93, %75, %cst_44 {dimension_numbers = #tpu.dot_dimension_numbers<[1], [1], [0], [0], [0, 0, 1, 0], [], []>} : vector<1x64xbf16>, vector<32x64xbf16>, vector<1x32xf32> -> vector<1x32xf32>
    %95 = tpu.concatenate %58, %94 in 0 : vector<1x32xf32>, vector<1x32xf32> -> vector<2x32xf32>
    %96 = arith.truncf %95 : vector<2x32xf32> to vector<2x32xbf16>
    %cst_45 = arith.constant dense<0.000000e+00> : vector<2x32xf32>
    %97 = tpu.matmul %96, %2, %cst_45 {dimension_numbers = #tpu.dot_dimension_numbers<[1], [0], [0], [1], [0, 0, 1, 1], [], []>} : vector<2x32xbf16>, vector<32x32xbf16>, vector<2x32xf32> -> vector<2x32xf32>
    %98 = vector.broadcast %12 : vector<1x32xf32> to vector<2x32xf32>
    %99 = arith.addf %97, %98 : vector<2x32xf32>
    %100 = arith.truncf %99 : vector<2x32xf32> to vector<2x32xbf16>
    %cst_46 = arith.constant dense<0.000000e+00> : vector<2x512xf32>
    %101 = tpu.matmul %100, %9, %cst_46 {dimension_numbers = #tpu.dot_dimension_numbers<[1], [0], [0], [1], [0, 0, 1, 1], [], []>} : vector<2x32xbf16>, vector<32x512xbf16>, vector<2x512xf32> -> vector<2x512xf32>
    %102 = vector.broadcast %13 : vector<1x512xf32> to vector<2x512xf32>
    %103 = arith.addf %101, %102 : vector<2x512xf32>
    %cst_47 = arith.constant 0.000000e+00 : f32
    %104 = vector.broadcast %cst_47 : f32 to vector<2x512xf32>
    %105 = arith.maximumf %103, %104 : vector<2x512xf32>
    %106 = arith.truncf %105 : vector<2x512xf32> to vector<2x512xbf16>
    %cst_48 = arith.constant dense<0.000000e+00> : vector<2x128xf32>
    %107 = tpu.matmul %106, %8, %cst_48 {dimension_numbers = #tpu.dot_dimension_numbers<[1], [0], [0], [1], [0, 0, 1, 1], [], []>} : vector<2x512xbf16>, vector<512x128xbf16>, vector<2x128xf32> -> vector<2x128xf32>
    %108 = vector.broadcast %14 : vector<1x128xf32> to vector<2x128xf32>
    %109 = arith.addf %107, %108 : vector<2x128xf32>
    %c0_49 = arith.constant 0 : index
    %c0_50 = arith.constant 0 : index
    %110 = vector.load %arg7[%c0_49, %c0_50] : memref<2x128xf32, #tpu.memory_space<vmem>>, vector<2x128xf32>
    tpu.vector_store %arg7[%c0_49, %c0_50], %109 {strides = array<i32>} : memref<2x128xf32, #tpu.memory_space<vmem>>, vector<2x128xf32>,
    return
  }
  func.func @transform_0(%arg0: i32) -> (i32, i32, i32) {
    %c0_i32 = arith.constant 0 : i32
    %c0_i32_0 = arith.constant 0 : i32
    %c0_i32_1 = arith.constant 0 : i32
    %c0_i32_2 = arith.constant 0 : i32
    return %c0_i32, %c0_i32_0, %c0_i32_1 : i32, i32, i32
  }
  func.func @transform_1(%arg0: i32) -> (i32, i32) {
    %c0_i32 = arith.constant 0 : i32
    %c0_i32_0 = arith.constant 0 : i32
    %c0_i32_1 = arith.constant 0 : i32
    return %c0_i32, %c0_i32_0 : i32, i32
  }
  func.func @transform_2(%arg0: i32) -> (i32, i32) {
    %c0_i32 = arith.constant 0 : i32
    %c0_i32_0 = arith.constant 0 : i32
    %c0_i32_1 = arith.constant 0 : i32
    return %c0_i32, %c0_i32_0 : i32, i32
  }
  func.func @transform_3(%arg0: i32) -> (i32, i32) {
    %c0_i32 = arith.constant 0 : i32
    %c0_i32_0 = arith.constant 0 : i32
    %c0_i32_1 = arith.constant 0 : i32
    return %c0_i32, %c0_i32_0 : i32, i32
  }
  func.func @transform_4(%arg0: i32) -> (i32, i32) {
    %c0_i32 = arith.constant 0 : i32
    %c0_i32_0 = arith.constant 0 : i32
    %c0_i32_1 = arith.constant 0 : i32
    return %c0_i32, %c0_i32_0 : i32, i32
  }
  func.func @transform_5(%arg0: i32) -> (i32, i32) {
    %c0_i32 = arith.constant 0 : i32
    %c0_i32_0 = arith.constant 0 : i32
    %c0_i32_1 = arith.constant 0 : i32
    return %c0_i32, %c0_i32_0 : i32, i32
  }
  func.func @transform_6(%arg0: i32) -> (i32, i32) {
    %c0_i32 = arith.constant 0 : i32
    %c0_i32_0 = arith.constant 0 : i32
    %c0_i32_1 = arith.constant 0 : i32
    return %c0_i32, %c0_i32_0 : i32, i32
  }
}

</mosaic_0001>

<bundles_post_ra>
// kernel: tpu_custom_call.1
= control target key start
LH: loop header
LB: loop body
LE: loop exit
PB: predicated region body
PF: predicated region fallthrough
CT: control target
= control target key end

     0   :  { %11 = vsyncpa [#allocation3], 0  ;;  %s1954_s0 = inlined_call_operand.vmem [shape: f32[2,9,48], index: 0, kind: input, shape index: {}]   ;;  %s1955_s1 = inlined_call_operand.vmem [shape: f32[16,32], index: 1, kind: input, shape index: {}]   ;;  %s1956_s2 = inlined_call_operand.hbm [shape: bf16[840,128], index: 2, kind: input, shape index: {}]   ;;  %s1957_s3 = inlined_call_operand.vmem [shape: bf16[32,512], index: 3, kind: input, shape index: {}]   ;;  %s1958_s4 = inlined_call_operand.vmem [shape: f32[1,864], index: 4, kind: input, shape index: {}]   ;;  %s1959_s5 = inlined_call_operand.vmem [shape: f32[64,1], index: 5, kind: input, shape index: {}]   ;;  %s1960_s6 = inlined_call_operand.hbm [shape: f32[2,128], index: 6, kind: output, shape index: {}]  }
   0x1   :  { %12 = vsyncpa [#allocation4], 0  ;;  %s21_s23 = sshll.u32 %s1956_s2, 4  ;;  %s1617_s24 = smov [#allocation2]   ;;  %s22_s23 = int_to_ptr.hbm [resolvable:$true] %s21_s23 }
   0x2   :  { %s23_s25 = sshll.u32 %s1617_s24, 4  ;;  %s1618_s26 = smov 64   ;;  %s24_s25 = int_to_ptr.vmem [resolvable:$true] %s23_s25 }
   0x3   :  { %s1619_s27 = smov 4  }
   0x4   :  { %29 = dma.hbm_to_vmem [thread:$0]  %s22_s23, 6720, %s24_s25, [#allocation3], %s1618_s26, %s1618_s26, %s1619_s27  }
   0x5   :  { %1613 = dma.done.wait [#allocation3], 6720  }
   0x6   :  { %1614 = vsyncadd [#allocation3], 4294960576  ;;  %v1664_v0 = vld [vmem:[#allocation2 + $0x50] sm:$0xff]  ;;  %v1666_v1 = vld [vmem:[#allocation2 + $0x48] sm:$0xff]  ;;  %s1620_s2 = smov 96   ;;  %vm228_vm0 = vcmask 392192  }
   0x7   :  { %237 = vmatpush.bf16.msra.mxu1 %v1664_v0  ;;  %v1672_v2 = vld [vmem:[%s1958_s4 + $0x6] ss:$0 sm:$0xff]  ;;  %v205_v5 = vld [vmem:[%s1954_s0 + $0x8] sm:$0x1]  ;;  %vm184_vm1 = vcmask 261120   ;;  %v1691_v14 = vld [vmem:[#allocation2 + $0x10] sm:$0xff] }
   0x8   :  { %225 = vrot.lane.b32.xlu0 %v1672_v2, %s1620_s2  ;;  %v1676_v3 = vld [vmem:[#allocation2 + $0x40] sm:$0xff]  ;;  %v1695_v15 = vld [vmem:[#allocation2 + $0x18] sm:$0xff]  ;;  %v1703_v17 = vld [vmem:[#allocation2 + $0x28] sm:$0xff]  ;;  %vm373_vm2 = vcmask 1043456   ;;  %vm374_vm3 = vcmask 1044480   ;;  %v1621_v21 = vmov 65535  }
   0x9   :  { %v204_v4 = vld [vmem:[%s1954_s0] sm:$0xff]  ;;  %v1259_v18 = vld [vmem:[#allocation2 + $0x58] sm:$0xf]  ;;  %v1484_v19 = vld [vmem:[#allocation2 + $0x58] sm:$0x10]  ;;  %v375_v22 = vsel %vm373_vm2, 4294967295, %v1621_v21 }
   0xa   :  { %v206_v6 = vpack.c.bf16 %v205_v5, %v204_v4  ;;  %v1699_v16 = vld [vmem:[#allocation2 + $0x20] sm:$0xff]  ;;  %v1260_v20 = vor.u32 %v1484_v19, %v1259_v18  ;;  %v376_v23 = vsel %vm374_vm3, %v375_v22, 0  ;;  %v161_v25 = vld [vmem:[%s1959_s5 + $0x18] sm:$0xff]  ;;  %v1622_v26 = vmov 0   ;;  %v160_v29 = vld [vmem:[%s1959_s5 + $0x10] sm:$0xff]  ;;  %s1623_s15 = smov [#allocation5]  }
   0xb   :  { %238 = vmatpush.bf16.msra.mxu1 %v1666_v1  ;;  %1552 = vset.pattern.permute.xlu1 %v1622_v26  ;;  %v158_v27 = vld [vmem:[%s1959_s5] sm:$0xff]  ;;  %v1474_v30 = vld [vmem:[#allocation2 + $0x8] sm:$0xff]  ;;  %v164_v31 = vld [vmem:[%s1959_s5 + $0x30] sm:$0xff]  ;;  %vm360_vm4 = vcmask 72704   ;;  %vm464_vm5 = vcmask 523264   ;;  %vm514_vm6 = vcmask 64512  }
   0xc   :  { %v1708_v24 = vand.u32 %v1260_v20, %v376_v23  ;;  %1551 = vset.pattern.permute.xlu0 %v1622_v26  ;;  %332 = vperm.xlu1 %1552, %v161_v25   ;;  %v1473_v34 = vld [vmem:[#allocation2] sm:$0xff]  ;;  %v165_v35 = vld [vmem:[%s1959_s5 + $0x38] sm:$0xff]  ;;  %v167_v37 = vld [vmem:[%s1955_s1 + $0x8] sm:$0xff]  ;;  %vm803_vm7 = vcmask 1040384   ;;  %s1203_s16 = sshll.u32 %s1623_s15, 4  ;;  %s1205_s19 = sshll.u32 %s1960_s6, 4  ;;  %s1204_s16 = int_to_ptr.vmem [resolvable:$true] %s1203_s16  ;;  %s1206_s19 = int_to_ptr.hbm [resolvable:$true] %s1205_s19 }
   0xd   :  { %1553 = vset.pattern.permute.xlu2 %v1622_v26  ;;  %194 = vmatpush.bf16.msra.mxu0 %v1474_v30  ;;  %v166_v36 = vld [vmem:[%s1955_s1] sm:$0xff]  ;;  %v163_v41 = vld [vmem:[%s1959_s5 + $0x28] sm:$0xff]  ;;  %v1762_v62 = vld [vmem:[#allocation2 + $0x90] sm:$0xff]  }
   0xe   :  { %387 = vmatpush.bf16.msra.mxu3 %v1708_v24  ;;  %v168_v38 = vpack.c.bf16 %v167_v37, %v166_v36  ;;  %v162_v39 = vld [vmem:[%s1959_s5 + $0x20] sm:$0xff]  ;;  %v159_v44 = vld [vmem:[%s1959_s5 + $0x8] sm:$0xff] }
   0xf   :  { %239 = vmatpush.bf16.msra.mxu1 %v1676_v3  ;;  %322 = vperm.xlu2 %1553, %v159_v44   ;;  %v1754_v57 = vld [vmem:[#allocation2 + $0x88] sm:$0xff]   ;;  %v1760_v61 = vld [vmem:[#allocation2 + $0x84] sm:$0xf] }
  0x10   :  { %327 = vperm.xlu0 %1551, %v160_v29   ;;  %v1532_v58 = vunpack.c.h.bf16 %v1754_v57  ;;  %v1531_v63 = vunpack.c.l.bf16 %v1754_v57 }
  0x11   :  { %195 = vmatpush.bf16.msra.mxu0 %v1473_v34 }
  0x12   :  { %1236 = vmatmul.msk.bf16.vlgmr.msra.gmra.mxu1 %vm228_vm0, %v206_v6  ;;  %v409_v6 = vunpack.c.l.bf16 %v1760_v61 }
  0x14   :  { %317 = vperm.xlu1 %1552, %v158_v27   ;;  %1223 = vmatmul.msk.bf16.vlgmr.msra.gmra.mxu0 %vm184_vm1, %v168_v38  ;;  %v1784_v38 = vld [vmem:[#allocation2 + $0x98] sm:$0xff]  }
  0x18   :  { %352 = vperm.xlu0 %1551, %v165_v35  }
  0x1c   :  { %347 = vperm.xlu1 %1552, %v164_v31  }
  0x20   :  { %342 = vperm.xlu0 %1551, %v163_v41   ;;  %v1788_v41 = vld [vmem:[#allocation2 + $0xa0] sm:$0xf] }
  0x24   :  { %337 = vperm.xlu1 %1552, %v162_v39   ;;  %v1540_v39 = vunpack.c.h.bf16 %v1784_v38 }
  0x28   :  { %818 = vrot.lane.b32.xlu0 %v1672_v2, %s1618_s26 }
  0x69   :  { %v1750_v55 = vpop.permute.xlu2 %322 }
  0x7a   :  { %v1686_v8 = vpop.permute.xlu0 %225 }
  0x7e   :  { %v1748_v53 = vpop.permute.xlu1 %332 }
  0x82   :  { %v1752_v56 = vpop.permute.xlu0 %327 }
  0x86   :  { %v1758_v60 = vpop.permute.xlu1 %317 }
  0x8a   :  { %v1780_v35 = vpop.permute.xlu0 %352 }
  0x8e   :  { %v1782_v36 = vpop.permute.xlu1 %347 }
  0x8f   :  { %v241_v7 = vpop.f32.mrf.mxu1 }
  0x90   :  { %v242_v10 = vadd.f32 %v241_v7, %v1686_v8 }
  0x91   :  { %v197_v27 = vpop.f32.mrf.mxu0 }
  0x92   :  { %v198_v30 = vadd.f32 %v1672_v2, %v197_v27 }
  0x97   :  { %v243_v9 = vpop.f32.mrf.mxu1 }
  0x98   :  { %v244_v11 = vadd.f32 %v243_v9, %v1686_v8  ;;  %v1535_v9 = vunpack.c.l.bf16 %v1762_v62 }
  0x99   :  { %v1810_v27 = vpop.f32.mrf.mxu0 }
  0x9a   :  { %v246_v12 = vpack.c.bf16 %v244_v11, %v242_v10 }
  0x9c   :  { %v280_v13 = vsel %vm184_vm1, %v246_v12, 0 }
  0x9d   :  { %289 = vmatpush.bf16.xpose.msra.mxu2 %v280_v13 }
  0xa4   :  { %1253 = vmatmul.msk.bf16.vlgmr.msra.gmra.mxu2 %vm184_vm1, %v1691_v14 }
  0xb4   :  { %1254 = vmatmul.msk.bf16.gmra.mxu2 %vm184_vm1, %v1695_v15 }
  0xc4   :  { %1255 = vmatmul.msk.bf16.gmra.mxu2 %vm184_vm1, %v1699_v16 }
  0xd4   :  { %1256 = vmatmul.msk.bf16.gmra.mxu2 %vm184_vm1, %v1703_v17 }
 0x127   :  { %v291_v28 = vpop.f32.mrf.mxu2 }
 0x12f   :  { %v293_v32 = vpop.f32.mrf.mxu2 }
 0x130   :  { %v311_v33 = vpack.c.bf16 %v293_v32, %v291_v28 }
 0x132   :  { %1261 = vmatmul.msk.bf16.vlgmr.msra.gmra.mxu3 %vm360_vm4, %v311_v33  ;;  %v202_v33 = vpack.c.bf16 %v198_v30, %v198_v30 }
 0x137   :  { %v296_v40 = vpop.f32.mrf.mxu2 }
 0x13f   :  { %v298_v42 = vpop.f32.mrf.mxu2 }
 0x140   :  { %v312_v43 = vpack.c.bf16 %v298_v42, %v296_v40  ;;  %v1790_v42 = vpop.permute.xlu0 %342 }
 0x142   :  { %1262 = vmatmul.msk.bf16.gmra.mxu3 %vm360_vm4, %v312_v43  ;;  %v1539_v43 = vunpack.c.l.bf16 %v1784_v38 }
 0x147   :  { %v301_v45 = vpop.f32.mrf.mxu2 }
 0x14f   :  { %v303_v46 = vpop.f32.mrf.mxu2 }
 0x150   :  { %v313_v47 = vpack.c.bf16 %v303_v46, %v301_v45  ;;  %v416_v46 = vunpack.c.l.bf16 %v1788_v41 }
 0x152   :  { %1263 = vmatmul.msk.bf16.gmra.mxu3 %vm360_vm4, %v313_v47  ;;  %v1797_v47 = vpop.permute.xlu1 %337 }
 0x157   :  { %v306_v48 = vpop.f32.mrf.mxu2 }
 0x15f   :  { %v308_v49 = vpop.f32.mrf.mxu2 }
 0x160   :  { %v314_v50 = vpack.c.bf16 %v308_v49, %v306_v48  ;;  %v1536_v49 = vunpack.c.h.bf16 %v1762_v62 }
 0x162   :  { %1264 = vmatmul.msk.bf16.gmra.mxu3 %vm360_vm4, %v314_v50 }
 0x1b5   :  { %v389_v51 = vpop.f32.mrf.mxu3 }
 0x1b6   :  { %v390_v5 = vadd.f32 %v389_v51, %v1758_v60 }
 0x1b8   :  { %v417_v13 = vmul.f32 %v409_v6, %v390_v5 }
 0x1ba   :  { %v425_v22 = vpack.c.bf16 %v417_v13, %v417_v13 }
 0x1bc   :  { %v440_v31 = vunpack.c.l.b16 %v425_v22 }
 0x1bd   :  { %v391_v52 = vpop.f32.mrf.mxu3 }
 0x1be   :  { %v392_v4 = vadd.f32 %v391_v52, %v1750_v55 }
 0x1c0   :  { %v418_v11 = vmul.f32 %v1531_v63, %v392_v4 }
 0x1c2   :  { %v426_v20 = vpack.c.bf16 %v418_v11, %v418_v11 }
 0x1c4   :  { %v441_v29 = vunpack.c.l.b16 %v426_v20 }
 0x1c5   :  { %v394_v54 = vpop.f32.mrf.mxu3 }
 0x1c6   :  { %v395_v59 = vadd.f32 %v394_v54, %v1752_v56  ;;  %v444_v32 = vpack.c.b16 %v441_v29, %v440_v31 }
 0x1c8   :  { %v419_v7 = vmul.f32 %v1532_v58, %v395_v59 }
 0x1ca   :  { %v427_v18 = vpack.c.bf16 %v419_v7, %v419_v7 }
 0x1cc   :  { %v442_v23 = vunpack.c.l.b16 %v427_v18 }
 0x1cd   :  { %v396_v10 = vpop.f32.mrf.mxu3 }
 0x1ce   :  { %v397_v12 = vadd.f32 %v396_v10, %v1748_v53 }
 0x1d0   :  { %v420_v19 = vmul.f32 %v1535_v9, %v397_v12 }
 0x1d2   :  { %v428_v21 = vpack.c.bf16 %v420_v19, %v420_v19 }
 0x1d4   :  { %v443_v25 = vunpack.c.l.b16 %v428_v21 }
 0x1d5   :  { %v399_v26 = vpop.f32.mrf.mxu3 }
 0x1d6   :  { %v445_v28 = vpack.c.b16 %v443_v25, %v442_v23  ;;  %v400_v50 = vadd.f32 %v399_v26, %v1797_v47  ;;  %v1488_v23 = vld [vmem:[#allocation2 + $0x78] sm:$0xff]  ;;  %v1487_v25 = vld [vmem:[#allocation2 + $0x70] sm:$0xff]  ;;  %v1486_v26 = vld [vmem:[#allocation2 + $0x68] sm:$0xff] }
 0x1d7   :  { %503 = vmatpush.bf16.msrb.mxu3 %v1488_v23  ;;  %732 = vmatpush.bf16.msrb.mxu2 %v1488_v23 }
 0x1d8   :  { %457 = vmatpush.bf16.msrb.mxu0 %v445_v28  ;;  %v421_v4 = vmul.f32 %v1536_v49, %v400_v50  ;;  %v1815_v28 = vld [vmem:[%s1958_s4 + $0x5] ss:$0 sm:$0xff] }
 0x1da   :  { %v429_v12 = vpack.c.bf16 %v421_v4, %v421_v4 }
 0x1db   :  { %504 = vmatpush.bf16.msrb.mxu3 %v1487_v25  ;;  %733 = vmatpush.bf16.msrb.mxu2 %v1487_v25 }
 0x1dc   :  { %458 = vmatpush.bf16.msrb.mxu0 %v444_v32  ;;  %v547_v20 = vunpack.c.l.b16 %v429_v12 }
 0x1dd   :  { %v401_v34 = vpop.f32.mrf.mxu3 }
 0x1de   :  { %v402_v44 = vadd.f32 %v401_v34, %v1790_v42 }
 0x1df   :  { %1265 = vmatmul.msk.bf16.vlgmr.msrb.gmra.mxu0 %vm184_vm1, %v202_v33  ;;  %505 = vmatpush.bf16.msrb.mxu3 %v1486_v26  ;;  %v1485_v33 = vld [vmem:[#allocation2 + $0x60] sm:$0xff] }
 0x1e0   :  { %v422_v52 = vmul.f32 %v1539_v43, %v402_v44  ;;  %734 = vmatpush.bf16.msrb.mxu2 %v1486_v26 }
 0x1e2   :  { %v430_v7 = vpack.c.bf16 %v422_v52, %v422_v52 }
 0x1e3   :  { %506 = vmatpush.bf16.msrb.mxu3 %v1485_v33 }
 0x1e4   :  { %v548_v18 = vunpack.c.l.b16 %v430_v7  ;;  %735 = vmatpush.bf16.msrb.mxu2 %v1485_v33 }
 0x1e5   :  { %v404_v37 = vpop.f32.mrf.mxu3 }
 0x1e6   :  { %v405_v40 = vadd.f32 %v404_v37, %v1782_v36  ;;  %v551_v21 = vpack.c.b16 %v548_v18, %v547_v20 }
 0x1e7   :  { %652 = vmatpush.bf16.msra.mxu3 %v1708_v24 }
 0x1e8   :  { %v423_v45 = vmul.f32 %v1540_v39, %v405_v40  ;;  %v557_v22 = vsel %vm464_vm5, %v551_v21, 0 }
 0x1ea   :  { %v431_v54 = vpack.c.bf16 %v423_v45, %v423_v45 }
 0x1ec   :  { %v549_v10 = vunpack.c.l.b16 %v431_v54 }
 0x1ed   :  { %v406_v48 = vpop.f32.mrf.mxu3 }
 0x1ee   :  { %v407_v51 = vadd.f32 %v406_v48, %v1780_v35  ;;  %v73_v48 = vld [vmem:[#allocation2 + $0x80] sm:$0xf] }
 0x1ef   :  { %v1822_v50 = vsel %vm373_vm2, %v73_v48, 0 }
 0x1f0   :  { %v424_v59 = vmul.f32 %v416_v46, %v407_v51  ;;  %528 = vmatpush.bf16.msra.mxu0 %v1822_v50 }
 0x1f2   :  { %v432_v5 = vpack.c.bf16 %v424_v59, %v424_v59  ;;  %v1285_v59 = vld [vmem:[%s1954_s0 + $0x10] sm:$0xff] }
 0x1f4   :  { %v550_v11 = vunpack.c.l.b16 %v432_v5  ;;  %587 = vmatpush.bf16.msrb.mxu0 %v1664_v0  ;;  %v1286_v0 = vld [vmem:[%s1954_s0 + $0x18] sm:$0x1] }
 0x1f5   :  { %v578_v4 = vpack.c.bf16 %v1286_v0, %v1285_v59 }
 0x1f6   :  { %v552_v13 = vpack.c.b16 %v550_v11, %v549_v10 }
 0x1f8   :  { %v560_v19 = vsel %vm464_vm5, %v552_v13, 0  ;;  %588 = vmatpush.bf16.msrb.mxu0 %v1666_v1 }
 0x1f9   :  { %568 = vmatpush.bf16.xpose.msrb.mxu1 %v560_v19 }
 0x1fc   :  { %589 = vmatpush.bf16.msrb.mxu0 %v1676_v3 }
 0x201   :  { %569 = vmatpush.bf16.xpose.msrb.mxu1 %v557_v22 }
 0x25c   :  { %v460_v29 = vpop.f32.mrf.mxu0 }
 0x25d   :  { %v461_v30 = vadd.f32 %v1815_v28, %v460_v29 }
 0x25f   :  { %v465_v31 = vsel %vm464_vm5, %v461_v30, -inf }
 0x260   :  { %466 = vmax.xlane.f32.xlu2 %v465_v31 }
 0x264   :  { %v462_v32 = vpop.f32.mrf.mxu0 }
 0x2d3   :  { %v467_v34 = vpop.xlane.xlu2 %466 }
 0x2d4   :  { %v468_v37 = vsub.f32 %v461_v30, %v467_v34 }
 0x2d6   :  { %v469_v40 = vmul.f32 1.442695, %v468_v37 }
 0x2d8   :  { %1557 = vpow2.f32 %v469_v40 }
 0x2de   :  { %v1558_v44 = vpop.eup %1557 }
 0x2df   :  { %v471_v45 = vpack.c.bf16 %v1558_v44, %v1558_v44 }
 0x2e1   :  { %1282 = vmatmul.msk.bf16.vlgmr.msrb.gmra.mxu3 %vm464_vm5, %v471_v45 }
 0x364   :  { %v508_v24 = vpop.f32.mrf.mxu3 }
 0x365   :  { %1559 = vrcp.f32 %v508_v24 }
 0x36b   :  { %v1560_v51 = vpop.eup %1559 }
 0x36c   :  { %v513_v52 = vpack.c.bf16 %v1560_v51, %v1560_v51  ;;  %v510_v54 = vpop.f32.mrf.mxu3 }
 0x36e   :  { %1283 = vmatmul.msk.bf16.vlgmr.msra.gmra.mxu0 %vm514_vm6, %v513_v52 }
 0x37e   :  { %1287 = vmatmul.msk.bf16.vlgmr.msrb.gmra.mxu0 %vm228_vm0, %v578_v4 }
 0x3eb   :  { %v530_v1 = vpop.f32.mrf.mxu0 }
 0x3ec   :  { %v534_v3 = vmul.f32 %v1558_v44, %v530_v1 }
 0x3ee   :  { %v535_v5 = vsel %vm464_vm5, %v534_v3, 0.0 }
 0x3ef   :  { %v536_v7 = vrot.slane %v535_v5, 4 }
 0x3f1   :  { %v537_v10 = vadd.f32 %v536_v7, %v535_v5 }
 0x3f3   :  { %v538_v11 = vrot.slane %v537_v10, 2  ;;  %v532_v12 = vpop.f32.mrf.mxu0 }
 0x3f5   :  { %v539_v13 = vadd.f32 %v538_v11, %v537_v10 }
 0x3f7   :  { %v540_v18 = vrot.slane %v539_v13, 1 }
 0x3f9   :  { %v541_v19 = vadd.f32 %v540_v18, %v539_v13 }
 0x3fb   :  { %v591_v20 = vpop.f32.mrf.mxu0  ;;  %v542_v21 = vpack.c.bf16 %v541_v19, %v541_v19 }
 0x3fc   :  { %v592_v23 = vadd.f32 %v591_v20, %v1686_v8 }
 0x3fd   :  { %1284 = vmatmul.msk.bf16.vlgmr.msrb.gmra.mxu1 %vm464_vm5, %v542_v21 }
 0x403   :  { %v593_v22 = vpop.f32.mrf.mxu0 }
 0x404   :  { %v594_v25 = vadd.f32 %v593_v22, %v1686_v8 }
 0x406   :  { %v596_v26 = vpack.c.bf16 %v594_v25, %v592_v23 }
 0x408   :  { %v598_v29 = vsel %vm184_vm1, %v596_v26, 0 }
 0x409   :  { %607 = vmatpush.bf16.xpose.msra.mxu1 %v598_v29 }
 0x410   :  { %1288 = vmatmul.msk.bf16.vlgmr.msra.gmra.mxu1 %vm184_vm1, %v1691_v14 }
 0x420   :  { %1289 = vmatmul.msk.bf16.gmra.mxu1 %vm184_vm1, %v1695_v15 }
 0x430   :  { %1290 = vmatmul.msk.bf16.gmra.mxu1 %vm184_vm1, %v1699_v16 }
 0x440   :  { %1291 = vmatmul.msk.bf16.gmra.mxu1 %vm184_vm1, %v1703_v17 }
 0x47a   :  { %v1849_v30 = vpop.f32.mrf.mxu1 }
 0x482   :  { %v573_v31 = vpop.f32.mrf.mxu1 }
 0x48d   :  { %v609_v8 = vpop.f32.mrf.mxu1 }
 0x495   :  { %v611_v32 = vpop.f32.mrf.mxu1 }
 0x496   :  { %v629_v33 = vpack.c.bf16 %v611_v32, %v609_v8 }
 0x498   :  { %1292 = vmatmul.msk.bf16.vlgmr.msra.gmra.mxu3 %vm360_vm4, %v629_v33 }
 0x49d   :  { %v614_v34 = vpop.f32.mrf.mxu1 }
 0x4a5   :  { %v616_v37 = vpop.f32.mrf.mxu1 }
 0x4a6   :  { %v630_v14 = vpack.c.bf16 %v616_v37, %v614_v34 }
 0x4a8   :  { %1293 = vmatmul.msk.bf16.gmra.mxu3 %vm360_vm4, %v630_v14 }
 0x4ad   :  { %v619_v15 = vpop.f32.mrf.mxu1 }
 0x4b5   :  { %v621_v40 = vpop.f32.mrf.mxu1 }
 0x4b6   :  { %v631_v44 = vpack.c.bf16 %v621_v40, %v619_v15 }
 0x4b8   :  { %1294 = vmatmul.msk.bf16.gmra.mxu3 %vm360_vm4, %v631_v44 }
 0x4bd   :  { %v624_v16 = vpop.f32.mrf.mxu1 }
 0x4c5   :  { %v626_v17 = vpop.f32.mrf.mxu1 }
 0x4c6   :  { %v632_v45 = vpack.c.bf16 %v626_v17, %v624_v16 }
 0x4c8   :  { %1295 = vmatmul.msk.bf16.gmra.mxu3 %vm360_vm4, %v632_v45 }
 0x51b   :  { %v654_v48 = vpop.f32.mrf.mxu3 }
 0x51c   :  { %v655_v59 = vadd.f32 %v654_v48, %v1758_v60 }
 0x51e   :  { %v674_v5 = vmul.f32 %v655_v59, %v409_v6 }
 0x520   :  { %v682_v11 = vpack.c.bf16 %v674_v5, %v674_v5  ;;  %v1479_v5 = vld [vmem:[#allocation2 + $0x30] sm:$0xff] }
 0x522   :  { %v694_v19 = vunpack.c.l.b16 %v682_v11  ;;  %v1527_v11 = vld [vmem:[%s1957_s3 + $0x2c] sm:$0xf0] }
 0x523   :  { %v656_v24 = vpop.f32.mrf.mxu3 }
 0x524   :  { %v657_v54 = vadd.f32 %v656_v24, %v1750_v55 }
 0x526   :  { %v675_v1 = vmul.f32 %v1531_v63, %v657_v54 }
 0x528   :  { %v683_v10 = vpack.c.bf16 %v675_v1, %v675_v1 }
 0x52b   :  { %v659_v51 = vpop.f32.mrf.mxu3 }
 0x52c   :  { %v660_v52 = vadd.f32 %v659_v51, %v1752_v56 }
 0x52e   :  { %v676_v0 = vmul.f32 %v1532_v58, %v660_v52  ;;  %v695_v58 = vunpack.c.l.b16 %v683_v10  ;;  %v1327_v10 = vld [vmem:[%s1957_s3 + $0x20] sm:$0xf] }
 0x530   :  { %v684_v7 = vpack.c.bf16 %v676_v0, %v676_v0  ;;  %v698_v57 = vpack.c.b16 %v695_v58, %v694_v19 }
 0x532   :  { %v696_v60 = vunpack.c.l.b16 %v684_v7  ;;  %v1526_v7 = vld [vmem:[%s1957_s3 + $0x2c] sm:$0xf] }
 0x533   :  { %v661_v4 = vpop.f32.mrf.mxu3 }
 0x534   :  { %v662_v3 = vadd.f32 %v661_v4, %v1748_v53  ;;  %v200_v53 = vadd.f32 %v1672_v2, %v1810_v27 }
 0x536   :  { %v677_v56 = vmul.f32 %v1535_v9, %v662_v3  ;;  %v203_v61 = vpack.c.bf16 %v200_v53, %v200_v53 }
 0x538   :  { %v685_v55 = vpack.c.bf16 %v677_v56, %v677_v56  ;;  %v1337_v56 = vld [vmem:[%s1957_s3 + $0x38] sm:$0xf0] }
 0x53a   :  { %v697_v12 = vunpack.c.l.b16 %v685_v55  ;;  %v1340_v55 = vor.u32 %v1526_v7, %v1337_v56  ;;  %v1506_v7 = vld [vmem:[#allocation2 + $0x12c] sm:$0xff]  ;;  %v1505_v56 = vld [vmem:[#allocation2 + $0x124] sm:$0xff] }
 0x53b   :  { %v664_v13 = vpop.f32.mrf.mxu3 }
 0x53c   :  { %v699_v18 = vpack.c.b16 %v697_v12, %v696_v60  ;;  %v665_v23 = vadd.f32 %v664_v13, %v1797_v47  ;;  %v1525_v60 = vld [vmem:[%s1957_s3 + $0x24] sm:$0xf]  ;;  %v1329_v12 = vld [vmem:[%s1957_s3 + $0x30] sm:$0xf0]  ;;  %v1328_v13 = vor.u32 %v1527_v11, %v1327_v10  ;;  %935 = vmatpush.bf16.msrb.mxu1 %v1340_v55  ;;  %v155_v10 = vld [vmem:[%s1958_s4] sm:$0xf] }
 0x53d   :  { %v1332_v58 = vor.u32 %v1525_v60, %v1329_v12  ;;  %v840_v55 = vperm.slane %v155_v10, 1  ;;  %v842_v11 = vperm.slane %v155_v10, 3 }
 0x53e   :  { %711 = vmatpush.bf16.msra.mxu0 %v699_v18 }
 0x542   :  { %712 = vmatpush.bf16.msra.mxu0 %v698_v57 }
 0x543   :  { %v666_v63 = vpop.f32.mrf.mxu3 }
 0x544   :  { %v667_v20 = vadd.f32 %v666_v63, %v1790_v42  ;;  %v1311_v63 = vld [vmem:[%s1957_s3] sm:$0xf] }
 0x545   :  { %1296 = vmatmul.msk.bf16.vlgmr.msra.gmra.mxu0 %vm184_vm1, %v203_v61 }
 0x546   :  { %753 = vmatpush.bf16.msrb.mxu0 %v1822_v50  ;;  %v679_v27 = vmul.f32 %v1539_v43, %v667_v20 }
 0x548   :  { %v687_v42 = vpack.c.bf16 %v679_v27, %v679_v27  ;;  %v1335_v27 = vld [vmem:[%s1957_s3 + $0x28] sm:$0xf] }
 0x54a   :  { %v773_v32 = vunpack.c.l.b16 %v687_v42 }
 0x54b   :  { %v669_v6 = vpop.f32.mrf.mxu3 }
 0x54c   :  { %v670_v9 = vadd.f32 %v669_v6, %v1782_v36  ;;  %v678_v36 = vmul.f32 %v1536_v49, %v665_v23  ;;  %v1523_v6 = vld [vmem:[%s1957_s3 + $0xc] sm:$0xf0] }
 0x54d   :  { %v1312_v20 = vor.u32 %v1523_v6, %v1311_v63 }
 0x54e   :  { %v680_v21 = vmul.f32 %v1540_v39, %v670_v9  ;;  %v686_v39 = vpack.c.bf16 %v678_v36, %v678_v36  ;;  %v1521_v9 = vld [vmem:[%s1957_s3 + $0x4] sm:$0xf] }
 0x550   :  { %v688_v25 = vpack.c.bf16 %v680_v21, %v680_v21  ;;  %v1522_v21 = vld [vmem:[%s1957_s3 + $0xc] sm:$0xf] }
 0x552   :  { %v774_v29 = vunpack.c.l.b16 %v688_v25  ;;  %v1528_v25 = vld [vmem:[%s1957_s3 + $0x34] sm:$0xf0] }
 0x553   :  { %v671_v22 = vpop.f32.mrf.mxu3  ;;  %v1336_v36 = vor.u32 %v1528_v25, %v1335_v27 }
 0x554   :  { %v672_v2 = vadd.f32 %v671_v22, %v1780_v35  ;;  %v772_v35 = vunpack.c.l.b16 %v686_v39  ;;  %v1321_v22 = vld [vmem:[%s1957_s3 + $0x18] sm:$0xf0] }
 0x555   :  { %v1520_v39 = vld [vmem:[#allocation2 + $0x19c] sm:$0xff] }
 0x556   :  { %v681_v50 = vmul.f32 %v672_v2, %v416_v46  ;;  %v776_v38 = vpack.c.b16 %v773_v32, %v772_v35  ;;  %v1324_v2 = vor.u32 %v1522_v21, %v1321_v22  ;;  %v1503_v32 = vld [vmem:[#allocation2 + $0x114] sm:$0xff]  ;;  %v1502_v35 = vld [vmem:[#allocation2 + $0x10c] sm:$0xff] }
 0x558   :  { %v689_v26 = vpack.c.bf16 %v681_v50, %v681_v50  ;;  %v782_v43 = vsel %vm464_vm5, %v776_v38, 0  ;;  %936 = vmatpush.bf16.msrb.mxu1 %v1324_v2  ;;  %v1319_v50 = vld [vmem:[%s1957_s3 + $0x8] sm:$0xf]  ;;  %v1494_v38 = vld [vmem:[#allocation2 + $0xcc] sm:$0xff] }
 0x55a   :  { %v775_v31 = vunpack.c.l.b16 %v689_v26  ;;  %v1524_v26 = vld [vmem:[%s1957_s3 + $0x14] sm:$0xf0] }
 0x55b   :  { %v1320_v42 = vor.u32 %v1524_v26, %v1319_v50 }
 0x55c   :  { %v777_v8 = vpack.c.b16 %v775_v31, %v774_v29  ;;  %v1496_v29 = vld [vmem:[#allocation2 + $0xdc] sm:$0xff]  ;;  %1184 = vmatpush.bf16.msra.mxu1 %v1520_v39 }
 0x55d   :  { %v1504_v31 = vld [vmem:[#allocation2 + $0x11c] sm:$0xff]  ;;  %1145 = vmatpush.bf16.msrb.mxu3 %v1496_v29 }
 0x55e   :  { %v785_v47 = vsel %vm464_vm5, %v777_v8, 0  ;;  %v1495_v8 = vld [vmem:[#allocation2 + $0xd4] sm:$0xff] }
 0x55f   :  { %793 = vmatpush.bf16.xpose.msra.mxu2 %v785_v47  ;;  %v1519_v47 = vld [vmem:[#allocation2 + $0x194] sm:$0xff] }
 0x560   :  { %1185 = vmatpush.bf16.msra.mxu1 %v1519_v47 }
 0x561   :  { %1146 = vmatpush.bf16.msrb.mxu3 %v1495_v8  ;;  %v1556_v8 = vld [vmem:[%s1958_s4 + $0x4] ss:$0 sm:$0xff] }
 0x565   :  { %1147 = vmatpush.bf16.msrb.mxu3 %v1494_v38 }
 0x567   :  { %794 = vmatpush.bf16.xpose.msra.mxu2 %v782_v43  ;;  %v1518_v43 = vld [vmem:[#allocation2 + $0x18c] sm:$0xff] }
 0x568   :  { %1186 = vmatpush.bf16.msra.mxu1 %v1518_v43 }
 0x5c2   :  { %v714_v41 = vpop.f32.mrf.mxu0 }
 0x5c3   :  { %v715_v46 = vadd.f32 %v1815_v28, %v714_v41  ;;  %v1480_v28 = vld [vmem:[#allocation2 + $0x38] sm:$0xff]  ;;  %v819_v41 = vpop.permute.xlu0 %818 }
 0x5c4   :  { %830 = vmatpush.bf16.msra.mxu0 %v1480_v28  ;;  %v1515_v28 = vld [vmem:[#allocation2 + $0x174] sm:$0xff] }
 0x5c5   :  { %v718_v62 = vsel %vm464_vm5, %v715_v46, -inf }
 0x5c6   :  { %719 = vmax.xlane.f32.xlu1 %v718_v62  ;;  %v1493_v62 = vld [vmem:[#allocation2 + $0xc4] sm:$0xff] }
 0x5c7   :  { %1148 = vmatpush.bf16.msrb.mxu3 %v1493_v62 }
 0x5c8   :  { %831 = vmatpush.bf16.msra.mxu0 %v1479_v5  ;;  %v1507_v5 = vld [vmem:[#allocation2 + $0x134] sm:$0xff] }
 0x5ca   :  { %v716_v49 = vpop.f32.mrf.mxu0 }
 0x639   :  { %v720_v33 = vpop.xlane.xlu1 %719 }
 0x63a   :  { %v721_v34 = vsub.f32 %v715_v46, %v720_v33  ;;  %v1501_v46 = vld [vmem:[#allocation2 + $0x104] sm:$0xff] }
 0x63b   :  { %v1517_v33 = vld [vmem:[#allocation2 + $0x184] sm:$0xff] }
 0x63c   :  { %v722_v37 = vmul.f32 1.442695, %v721_v34  ;;  %1187 = vmatpush.bf16.msra.mxu1 %v1517_v33 }
 0x63e   :  { %1561 = vpow2.f32 %v722_v37  ;;  %v1512_v37 = vld [vmem:[#allocation2 + $0x15c] sm:$0xff] }
 0x644   :  { %v1562_v14 = vpop.eup %1561 }
 0x645   :  { %v724_v15 = vpack.c.bf16 %v1562_v14, %v1562_v14 }
 0x647   :  { %1297 = vmatmul.msk.bf16.vlgmr.msrb.gmra.mxu2 %vm464_vm5, %v724_v15  ;;  %v1500_v15 = vld [vmem:[#allocation2 + $0xfc] sm:$0xff] }
 0x648   :  { %896 = vmatpush.bf16.msrb.mxu2 %v1328_v13 }
 0x64c   :  { %897 = vmatpush.bf16.msrb.mxu2 %v1312_v20 }
 0x6ca   :  { %v737_v40 = vpop.f32.mrf.mxu2 }
 0x6cb   :  { %1563 = vrcp.f32 %v737_v40  ;;  %v1492_v40 = vld [vmem:[#allocation2 + $0xbc] sm:$0xff] }
 0x6cc   :  { %1149 = vmatpush.bf16.msrb.mxu3 %v1492_v40 }
 0x6d1   :  { %v1564_v44 = vpop.eup %1563 }
 0x6d2   :  { %v742_v16 = vpack.c.bf16 %v1564_v44, %v1564_v44  ;;  %v739_v17 = vpop.f32.mrf.mxu2  ;;  %v1516_v44 = vld [vmem:[#allocation2 + $0x17c] sm:$0xff] }
 0x6d3   :  { %1188 = vmatpush.bf16.msra.mxu1 %v1516_v44 }
 0x6d4   :  { %1298 = vmatmul.msk.bf16.vlgmr.msrb.gmra.mxu0 %vm514_vm6, %v742_v16  ;;  %v1499_v16 = vld [vmem:[#allocation2 + $0xf4] sm:$0xff] }
 0x6d5   :  { %909 = vmatpush.bf16.msrb.mxu0 %v1332_v58 }
 0x6d7   :  { %1189 = vmatpush.bf16.msra.mxu1 %v1515_v28 }
 0x751   :  { %v755_v45 = vpop.f32.mrf.mxu0 }
 0x752   :  { %v759_v48 = vmul.f32 %v1562_v14, %v755_v45  ;;  %v1498_v45 = vld [vmem:[#allocation2 + $0xec] sm:$0xff] }
 0x754   :  { %v760_v24 = vsel %vm464_vm5, %v759_v48, 0.0  ;;  %v1514_v48 = vld [vmem:[#allocation2 + $0x16c] sm:$0xff] }
 0x755   :  { %v761_v51 = vrot.slane %v760_v24, 4  ;;  %1190 = vmatpush.bf16.msra.mxu1 %v1514_v48 }
 0x757   :  { %v762_v52 = vadd.f32 %v761_v51, %v760_v24  ;;  %v1491_v24 = vld [vmem:[#allocation2 + $0xb4] sm:$0xff] }
 0x758   :  { %v1511_v51 = vld [vmem:[#allocation2 + $0x154] sm:$0xff]  ;;  %1150 = vmatpush.bf16.msrb.mxu3 %v1491_v24 }
 0x759   :  { %v763_v54 = vrot.slane %v762_v52, 2  ;;  %v757_v59 = vpop.f32.mrf.mxu0 }
 0x75a   :  { %v1490_v59 = vld [vmem:[#allocation2 + $0xac] sm:$0xff] }
 0x75b   :  { %v764_v0 = vadd.f32 %v763_v54, %v762_v52  ;;  %v1497_v52 = vld [vmem:[#allocation2 + $0xe4] sm:$0xff] }
 0x75c   :  { %v1513_v54 = vld [vmem:[#allocation2 + $0x164] sm:$0xff]  ;;  %1151 = vmatpush.bf16.msrb.mxu3 %v1490_v59 }
 0x75d   :  { %v765_v4 = vrot.slane %v764_v0, 1  ;;  %1191 = vmatpush.bf16.msra.mxu1 %v1513_v54 }
 0x75f   :  { %v766_v1 = vadd.f32 %v765_v4, %v764_v0  ;;  %v1510_v0 = vld [vmem:[#allocation2 + $0x14c] sm:$0xff]  ;;  %v1489_v4 = vld [vmem:[#allocation2 + $0xa4] sm:$0xff] }
 0x760   :  { %1152 = vmatpush.bf16.msrb.mxu3 %v1489_v4 }
 0x761   :  { %v767_v3 = vpack.c.bf16 %v766_v1, %v766_v1  ;;  %v1509_v1 = vld [vmem:[#allocation2 + $0x144] sm:$0xff] }
 0x763   :  { %1299 = vmatmul.msk.bf16.vlgmr.msra.gmra.mxu2 %vm464_vm5, %v767_v3  ;;  %v1508_v3 = vld [vmem:[#allocation2 + $0x13c] sm:$0xff] }
 0x764   :  { %922 = vmatpush.bf16.msra.mxu2 %v1336_v36 }
 0x768   :  { %923 = vmatpush.bf16.msra.mxu2 %v1320_v42 }
 0x7e6   :  { %v796_v18 = vpop.f32.mrf.mxu2 }
 0x7e7   :  { %v801_v19 = vrot.slane %v796_v18, 7 }
 0x7e9   :  { %v804_v53 = vsel %vm803_vm7, %v1849_v30, %v801_v19  ;;  %v1313_v30 = vld [vmem:[%s1957_s3 + $0x10] sm:$0xf0]  ;;  %v839_v19 = vperm.slane %v155_v10, 0 }
 0x7ea   :  { %v805_v57 = vpack.c.bf16 %v804_v53, %v804_v53  ;;  %v1316_v23 = vor.u32 %v1521_v9, %v1313_v30 }
 0x7ec   :  { %1308 = vmatmul.msk.bf16.vlgmr.msra.gmra.mxu0 %vm184_vm1, %v805_v57 }
 0x7ed   :  { %910 = vmatpush.bf16.msrb.mxu0 %v1316_v23  ;;  %v841_v23 = vperm.slane %v155_v10, 2 }
 0x7ee   :  { %v798_v61 = vpop.f32.mrf.mxu2 }
 0x7f1   :  { %1158 = vmatpush.bf16.msra.mxu0 %v1504_v31 }
 0x7f5   :  { %1159 = vmatpush.bf16.msra.mxu0 %v1503_v32 }
 0x7f9   :  { %1160 = vmatpush.bf16.msra.mxu0 %v1502_v35 }
 0x7fd   :  { %1161 = vmatpush.bf16.msra.mxu0 %v1501_v46 }
 0x801   :  { %1162 = vmatpush.bf16.msra.mxu0 %v1500_v15 }
 0x805   :  { %1163 = vmatpush.bf16.msra.mxu0 %v1499_v16 }
 0x809   :  { %1164 = vmatpush.bf16.msra.mxu0 %v1498_v45 }
 0x80d   :  { %1165 = vmatpush.bf16.msra.mxu0 %v1497_v52 }
 0x869   :  { %v833_v49 = vpop.f32.mrf.mxu0 }
 0x86a   :  { %v834_v34 = vadd.f32 %v833_v49, %v819_v41 }
 0x86c   :  { %v837_v14 = vpack.c.bf16 %v834_v34, %v834_v34 }
 0x86e   :  { %1341 = vmatmul.msk.bf16.vlgmr.msrb.gmra.mxu2 %vm184_vm1, %v837_v14  ;;  %1342 = vmatmul.msk.bf16.vlgmr.msrb.gmra.mxu0 %vm184_vm1, %v837_v14 }
 0x86f   :  { %1344 = vmatmul.msk.bf16.vlgmr.msrb.gmra.mxu1 %vm184_vm1, %v837_v14  ;;  %1171 = vmatpush.bf16.msrb.mxu2 %v1512_v37 }
 0x871   :  { %v835_v17 = vpop.f32.mrf.mxu0 }
 0x873   :  { %1172 = vmatpush.bf16.msrb.mxu2 %v1511_v51 }
 0x877   :  { %1173 = vmatpush.bf16.msrb.mxu2 %v1510_v0 }
 0x87b   :  { %1174 = vmatpush.bf16.msrb.mxu2 %v1509_v1 }
 0x87e   :  { %1343 = vmatmul.msk.bf16.vlgmr.msra.gmra.mxu2 %vm184_vm1, %v837_v14 }
 0x87f   :  { %1175 = vmatpush.bf16.msrb.mxu2 %v1508_v3 }
 0x883   :  { %1176 = vmatpush.bf16.msrb.mxu2 %v1507_v5 }
 0x887   :  { %1177 = vmatpush.bf16.msrb.mxu2 %v1506_v7 }
 0x88b   :  { %1178 = vmatpush.bf16.msrb.mxu2 %v1505_v56 }
 0x8eb   :  { %v912_v60 = vpop.f32.mrf.mxu0 }
 0x8ec   :  { %v913_v12 = vadd.f32 %v912_v60, %v840_v55  ;;  %v938_v13 = vpop.f32.mrf.mxu1 }
 0x8ed   :  { %v939_v58 = vadd.f32 %v938_v13, %v842_v11 }
 0x8ee   :  { %v943_v18 = vmax.f32 %v913_v12, 0.0 }
 0x8ef   :  { %v945_v53 = vmax.f32 %v939_v58, 0.0 }
 0x8f0   :  { %v947_v57 = vpack.c.bf16 %v943_v18, %v943_v18 }
 0x8f1   :  { %v949_v61 = vpack.c.bf16 %v945_v53, %v945_v53  ;;  %v899_v63 = vpop.f32.mrf.mxu2 }
 0x8f2   :  { %v900_v6 = vadd.f32 %v899_v63, %v839_v19  ;;  %1166 = vmatmul.bf16.vlgmr.msra.gmra.mxu0 %v947_v57 }
 0x8f3   :  { %1192 = vmatmul.bf16.vlgmr.msra.gmra.mxu1 %v949_v61  ;;  %v914_v9 = vpop.f32.mrf.mxu0 }
 0x8f4   :  { %v942_v20 = vmax.f32 %v900_v6, 0.0  ;;  %v940_v30 = vpop.f32.mrf.mxu1 }
 0x8f6   :  { %v946_v21 = vpack.c.bf16 %v942_v20, %v942_v20 }
 0x8f8   :  { %1153 = vmatmul.bf16.vlgmr.msrb.gmra.mxu3 %v946_v21 }
 0x8f9   :  { %v901_v22 = vpop.f32.mrf.mxu2 }
 0x901   :  { %v925_v2 = vpop.f32.mrf.mxu2 }
 0x902   :  { %v926_v27 = vadd.f32 %v925_v2, %v841_v23 }
 0x904   :  { %v944_v25 = vmax.f32 %v926_v27, 0.0 }
 0x906   :  { %v948_v50 = vpack.c.bf16 %v944_v25, %v944_v25 }
 0x908   :  { %1179 = vmatmul.bf16.vlgmr.msrb.gmra.mxu2 %v948_v50 }
 0x909   :  { %v927_v36 = vpop.f32.mrf.mxu2 }
 0x96f   :  { %v1167_v26 = vpop.f32.mrf.mxu0 }
 0x970   :  { %v1193_v42 = vpop.f32.mrf.mxu1 }
 0x977   :  { %v1169_v29 = vpop.f32.mrf.mxu0 }
 0x978   :  { %v1195_v31 = vpop.f32.mrf.mxu1 }
 0x97b   :  { %v1154_v39 = vpop.f32.mrf.mxu3 }
 0x97c   :  { %v1155_v47 = vadd.f32 %v1556_v8, %v1154_v39 }
 0x97e   :  { %v1168_v35 = vadd.f32 %v1167_v26, %v1155_v47 }
 0x983   :  { %v1156_v32 = vpop.f32.mrf.mxu3 }
 0x98b   :  { %v1180_v38 = vpop.f32.mrf.mxu2 }
 0x98c   :  { %v1181_v43 = vadd.f32 %v1180_v38, %v1168_v35 }
 0x98e   :  { %v1194_v41 = vadd.f32 %v1193_v42, %v1181_v43 }
 0x990   :  { %1197 = vst [vmem:[#allocation5] sm:$0x3] %v1194_v41 }
 0x991   :  { %1208 = dma.vmem_to_hbm [thread:$0]  %s1204_s16, 32, %s1206_s19, [#allocation4]  }
 0x993   :  { %v1182_v46 = vpop.f32.mrf.mxu2 }
 0x994   :  { %1615 = dma.done.wait [#allocation4], 32  }
 0x995   :  { %1616 = vsyncadd [#allocation4], 4294967264 }
 0x996   :  { %1213 = vsyncpa [#allocation3], 1 }
 0x997   :  { %1214 = vsyncpa [#allocation4], 1 }

</bundles_post_ra>
